<compile_context>
chip_gen: v7x
topology: tpu7x:2x2x1
jax: 0.10.0
libtpu: 0.0.40
codegen_flags: <defaults>
</compile_context>

<pallas_src>
import functools

import jax
import jax.numpy as jnp
from jax.experimental import pallas as pl
from jax.experimental.pallas import tpu as pltpu

K_IN = 784        # contraction dim (28*28); divisible by 8, kept unpadded
H_VALID = 100     # logical hidden / output dim
H_PAD = 128       # lane-dense hidden / output dim
_NEG_BIG = -1e30  # additive mask for padded feature lanes (exp -> 0 in f32)


def _round_up(n, m):
    return ((n + m - 1) // m) * m


def _cdiv(a, b):
    return (a + b - 1) // b


def dnnet_kernel(x_ref, w1_ref, b1_ref, w2_ref, b2_ref, mask_ref, o_ref):
    # Cast the activation tile to bf16 inside the kernel (MXU operands),
    # accumulate in f32.
    x = x_ref[...].astype(jnp.bfloat16)

    # fc1 + ReLU (bias / ReLU in f32).
    h1 = jnp.dot(x, w1_ref[...], preferred_element_type=jnp.float32)
    h1 = jnp.maximum(h1 + b1_ref[...], 0.0)

    # fc2 + ReLU. Padded lanes of h1 are exactly 0 and padded rows of w2 are 0,
    # so the lane padding contributes nothing to the product.
    h2 = jnp.dot(h1.astype(jnp.bfloat16), w2_ref[...],
                 preferred_element_type=jnp.float32)
    h2 = jnp.maximum(h2 + b2_ref[...], 0.0)

    # Single additive-mask pass pushes the 28 padded lanes to ~-1e30 so they
    # vanish from the log_softmax normalizer (row max comes from valid lanes,
    # which are >= 0 after ReLU).
    h2 = h2 + mask_ref[...]

    # Numerically stable log_softmax over the feature axis.
    m = jnp.max(h2, axis=-1, keepdims=True)
    shifted = h2 - m
    lse = jnp.log(jnp.sum(jnp.exp(shifted), axis=-1, keepdims=True))
    o_ref[...] = (shifted - lse).astype(o_ref.dtype)


def prepare_params(w1, b1, w2, b2):
    """Pad/cast weights ONCE (call at init time, not per forward)."""
    w1_p = (jnp.zeros((K_IN, H_PAD), jnp.float32)
            .at[:, :H_VALID].set(w1).astype(jnp.bfloat16))
    w2_p = (jnp.zeros((H_PAD, H_PAD), jnp.float32)
            .at[:H_VALID, :H_VALID].set(w2).astype(jnp.bfloat16))
    # Biases + mask stay f32 (elementwise math runs in f32).
    b1_p = jnp.zeros((1, H_PAD), jnp.float32).at[0, :H_VALID].set(b1)
    b2_p = jnp.zeros((1, H_PAD), jnp.float32).at[0, :H_VALID].set(b2)
    mask = jnp.full((1, H_PAD), _NEG_BIG, jnp.float32).at[0, :H_VALID].set(0.0)
    return w1_p, b1_p, w2_p, b2_p, mask


def _choose_batch_tile(B, tb_max):
    """Multiple of 8, <= tb_max, low padding waste, and >= 2 grid steps when
    possible so the 'parallel' batch axis spans both v7x TensorCores."""
    B8 = _round_up(max(B, 1), 8)
    if B8 <= 8:
        return 8
    n_tiles = max(2, _cdiv(B8, tb_max))
    return min(tb_max, _round_up(_cdiv(B8, n_tiles), 8))


@functools.partial(jax.jit, static_argnames=("tb_max",))
def dnnet_forward(x, w1_p, b1_p, w2_p, b2_p, mask, *, tb_max=2048):
    # Flatten exactly like x.view(-1, 784); feed the unpadded f32 activation
    # straight into the kernel (no wrapper pad/cast pass over x).
    x2d = x.reshape(-1, K_IN).astype(jnp.float32)
    B = x2d.shape[0]
    if B == 0:
        return jnp.zeros((0, H_VALID), jnp.float32)

    TB = _choose_batch_tile(B, tb_max)
    B_pad = _round_up(max(B, TB), TB)
    if B_pad != B:
        # Only unaligned batches pay a pad pass; aligned ones go straight in.
        x2d = jnp.pad(x2d, ((0, B_pad - B), (0, 0)))

    grid = (B_pad // TB,)

    out = pl.pallas_call(
        dnnet_kernel,
        out_shape=jax.ShapeDtypeStruct((B_pad, H_PAD), jnp.float32),
        grid_spec=pltpu.PrefetchScalarGridSpec(
            num_scalar_prefetch=0,
            grid=grid,
            in_specs=[
                pl.BlockSpec((TB, K_IN), lambda i: (i, 0)),      # x tile (pipelined)
                pl.BlockSpec((K_IN, H_PAD), lambda i: (0, 0)),   # w1 (VMEM-resident)
                pl.BlockSpec((1, H_PAD), lambda i: (0, 0)),      # b1
                pl.BlockSpec((H_PAD, H_PAD), lambda i: (0, 0)),  # w2
                pl.BlockSpec((1, H_PAD), lambda i: (0, 0)),      # b2
                pl.BlockSpec((1, H_PAD), lambda i: (0, 0)),      # lane mask
            ],
            out_specs=pl.BlockSpec((TB, H_PAD), lambda i: (i, 0)),
        ),
        compiler_params=pltpu.CompilerParams(
            dimension_semantics=("parallel",),
            # TB=2048: ~12.3 MiB double-buffered x (f32) + ~2 MiB out + <0.5 MiB
            # weights. 32 MiB fits v5e/v6e/v7x physical VMEM with headroom and
            # raises v5e's 16 MiB scoped default.
            vmem_limit_bytes=32 * 1024 * 1024,
        ),
    )(x2d, w1_p, b1_p, w2_p, b2_p, mask)

    # Strip batch / feature padding (padded lanes hold ~-1e30, padded rows junk).
    return out[:B, :H_VALID]


def init_params(key):
    # nn.Linear default init: U(-1/sqrt(in), 1/sqrt(in)); weights stored as
    # (in_features, out_features) so the kernel computes x @ W + b.
    k1, k2, k3, k4 = jax.random.split(key, 4)
    lim1 = 1.0 / jnp.sqrt(784.0)
    lim2 = 1.0 / jnp.sqrt(100.0)
    w1 = jax.random.uniform(k1, (784, 100), jnp.float32, -lim1, lim1)
    b1 = jax.random.uniform(k2, (100,), jnp.float32, -lim1, lim1)
    w2 = jax.random.uniform(k3, (100, 100), jnp.float32, -lim2, lim2)
    b2 = jax.random.uniform(k4, (100,), jnp.float32, -lim2, lim2)
    # fc3 (100 -> 10) is defined in __init__ but unused in forward; omitted.
    return w1, b1, w2, b2


if __name__ == "__main__":
    key = jax.random.PRNGKey(0)
    kx, kp = jax.random.split(key)

    # MNIST-like NCHW input: (batch=8, 1, 28, 28) -> view(-1, 784)
    x = jax.random.normal(kx, (8, 1, 28, 28), jnp.float32)
    w1, b1, w2, b2 = init_params(kp)

    # Pad/cast weights once (init-time), not per forward call.
    params = prepare_params(w1, b1, w2, b2)

    out = dnnet_forward(x, *params)
    out = jax.block_until_ready(out)

    # Reference check in plain f32 JAX (kernel uses bf16 matmul operands with
    # f32 accumulation, so tolerance is relaxed accordingly).
    x2d = x.reshape(-1, 784)
    h1 = jnp.maximum(x2d @ w1 + b1, 0.0)
    h2 = jnp.maximum(h1 @ w2 + b2, 0.0)
    ref = jax.nn.log_softmax(h2, axis=-1)

    assert out.shape == (8, 100), out.shape
    assert bool(jnp.all(jnp.isfinite(out)))
    err = float(jnp.max(jnp.abs(out - ref)))
    assert err < 5e-2, err

    print("KERNEL_OK")
</pallas_src>

<mosaic_0001>
module attributes {stable_mosaic.version = 11 : i64} {
  func.func @dnnet_kernel(%arg0: i32, %arg1: memref<8x784xf32, #tpu.memory_space<vmem>>, %arg2: memref<784x128xbf16, #tpu.memory_space<vmem>>, %arg3: memref<1x128xf32, #tpu.memory_space<vmem>>, %arg4: memref<128x128xbf16, #tpu.memory_space<vmem>>, %arg5: memref<1x128xf32, #tpu.memory_space<vmem>>, %arg6: memref<1x128xf32, #tpu.memory_space<vmem>>, %arg7: memref<8x128xf32, #tpu.memory_space<vmem>>) attributes {dimension_semantics = [#tpu.dimension_semantics<parallel>], iteration_bounds = array<i64: 1>, scalar_prefetch = 0 : i64, scratch_operands = 0 : i64, tpu.core_type = #tpu.core_type<tc>, window_params = [{transform_indices = @transform_0, window_bounds = array<i64: 8, 784>}, {pipeline_mode = #tpu.pipeline_mode<synchronous>, transform_indices = @transform_1, window_bounds = array<i64: 784, 128>}, {pipeline_mode = #tpu.pipeline_mode<synchronous>, transform_indices = @transform_2, window_bounds = array<i64: 1, 128>}, {pipeline_mode = #tpu.pipeline_mode<synchronous>, transform_indices = @transform_3, window_bounds = array<i64: 128, 128>}, {pipeline_mode = #tpu.pipeline_mode<synchronous>, transform_indices = @transform_4, window_bounds = array<i64: 1, 128>}, {pipeline_mode = #tpu.pipeline_mode<synchronous>, transform_indices = @transform_5, window_bounds = array<i64: 1, 128>}, {transform_indices = @transform_6, window_bounds = array<i64: 8, 128>}]} {
    %c0 = arith.constant 0 : index
    %c0_0 = arith.constant 0 : index
    %0 = vector.load %arg1[%c0, %c0_0] : memref<8x784xf32, #tpu.memory_space<vmem>>, vector<8x784xf32>
    %1 = arith.truncf %0 : vector<8x784xf32> to vector<8x784xbf16>
    %c0_1 = arith.constant 0 : index
    %c0_2 = arith.constant 0 : index
    %2 = vector.load %arg2[%c0_1, %c0_2] : memref<784x128xbf16, #tpu.memory_space<vmem>>, vector<784x128xbf16>
    %cst = arith.constant dense<0.000000e+00> : vector<8x128xf32>
    %3 = tpu.matmul %1, %2, %cst {dimension_numbers = #tpu.dot_dimension_numbers<[1], [0], [0], [1], [0, 0, 1, 1], [], []>} : vector<8x784xbf16>, vector<784x128xbf16>, vector<8x128xf32> -> vector<8x128xf32>
    %c0_3 = arith.constant 0 : index
    %c0_4 = arith.constant 0 : index
    %4 = vector.load %arg3[%c0_3, %c0_4] : memref<1x128xf32, #tpu.memory_space<vmem>>, vector<1x128xf32>
    %5 = vector.broadcast %4 : vector<1x128xf32> to vector<8x128xf32>
    %6 = arith.addf %3, %5 : vector<8x128xf32>
    %cst_5 = arith.constant 0.000000e+00 : f32
    %7 = vector.broadcast %cst_5 : f32 to vector<8x128xf32>
    %8 = arith.maximumf %6, %7 : vector<8x128xf32>
    %9 = arith.truncf %8 : vector<8x128xf32> to vector<8x128xbf16>
    %c0_6 = arith.constant 0 : index
    %c0_7 = arith.constant 0 : index
    %10 = vector.load %arg4[%c0_6, %c0_7] : memref<128x128xbf16, #tpu.memory_space<vmem>>, vector<128x128xbf16>
    %cst_8 = arith.constant dense<0.000000e+00> : vector<8x128xf32>
    %11 = tpu.matmul %9, %10, %cst_8 {dimension_numbers = #tpu.dot_dimension_numbers<[1], [0], [0], [1], [0, 0, 1, 1], [], []>} : vector<8x128xbf16>, vector<128x128xbf16>, vector<8x128xf32> -> vector<8x128xf32>
    %c0_9 = arith.constant 0 : index
    %c0_10 = arith.constant 0 : index
    %12 = vector.load %arg5[%c0_9, %c0_10] : memref<1x128xf32, #tpu.memory_space<vmem>>, vector<1x128xf32>
    %13 = vector.broadcast %12 : vector<1x128xf32> to vector<8x128xf32>
    %14 = arith.addf %11, %13 : vector<8x128xf32>
    %cst_11 = arith.constant 0.000000e+00 : f32
    %15 = vector.broadcast %cst_11 : f32 to vector<8x128xf32>
    %16 = arith.maximumf %14, %15 : vector<8x128xf32>
    %c0_12 = arith.constant 0 : index
    %c0_13 = arith.constant 0 : index
    %17 = vector.load %arg6[%c0_12, %c0_13] : memref<1x128xf32, #tpu.memory_space<vmem>>, vector<1x128xf32>
    %18 = vector.broadcast %17 : vector<1x128xf32> to vector<8x128xf32>
    %19 = arith.addf %16, %18 : vector<8x128xf32>
    %cst_14 = arith.constant dense<0xFF800000> : vector<8xf32>
    %20 = vector.multi_reduction <maximumf>, %19, %cst_14 [1] : vector<8x128xf32> to vector<8xf32>
    %21 = vector.shape_cast %20 : vector<8xf32> to vector<8x1xf32>
    %22 = vector.broadcast %21 : vector<8x1xf32> to vector<8x128xf32>
    %23 = arith.subf %19, %22 : vector<8x128xf32>
    %24 = math.exp %23 : vector<8x128xf32>
    %cst_15 = arith.constant dense<0.000000e+00> : vector<8xf32>
    %25 = vector.multi_reduction <add>, %24, %cst_15 [1] : vector<8x128xf32> to vector<8xf32>
    %26 = vector.shape_cast %25 : vector<8xf32> to vector<8x1xf32>
    %27 = math.log %26 : vector<8x1xf32>
    %28 = vector.broadcast %27 : vector<8x1xf32> to vector<8x128xf32>
    %29 = arith.subf %23, %28 : vector<8x128xf32>
    %c0_16 = arith.constant 0 : index
    %c0_17 = arith.constant 0 : index
    %30 = vector.load %arg7[%c0_16, %c0_17] : memref<8x128xf32, #tpu.memory_space<vmem>>, vector<8x128xf32>
    tpu.vector_store %arg7[%c0_16, %c0_17], %29 {strides = array<i32>} : memref<8x128xf32, #tpu.memory_space<vmem>>, vector<8x128xf32>,
    return
  }
  func.func @transform_0(%arg0: i32) -> (i32, i32) {
    %c0_i32 = arith.constant 0 : i32
    %c0_i32_0 = arith.constant 0 : i32
    return %arg0, %c0_i32 : i32, i32
  }
  func.func @transform_1(%arg0: i32) -> (i32, i32) {
    %c0_i32 = arith.constant 0 : i32
    %c0_i32_0 = arith.constant 0 : i32
    %c0_i32_1 = arith.constant 0 : i32
    return %c0_i32, %c0_i32_0 : i32, i32
  }
  func.func @transform_2(%arg0: i32) -> (i32, i32) {
    %c0_i32 = arith.constant 0 : i32
    %c0_i32_0 = arith.constant 0 : i32
    %c0_i32_1 = arith.constant 0 : i32
    return %c0_i32, %c0_i32_0 : i32, i32
  }
  func.func @transform_3(%arg0: i32) -> (i32, i32) {
    %c0_i32 = arith.constant 0 : i32
    %c0_i32_0 = arith.constant 0 : i32
    %c0_i32_1 = arith.constant 0 : i32
    return %c0_i32, %c0_i32_0 : i32, i32
  }
  func.func @transform_4(%arg0: i32) -> (i32, i32) {
    %c0_i32 = arith.constant 0 : i32
    %c0_i32_0 = arith.constant 0 : i32
    %c0_i32_1 = arith.constant 0 : i32
    return %c0_i32, %c0_i32_0 : i32, i32
  }
  func.func @transform_5(%arg0: i32) -> (i32, i32) {
    %c0_i32 = arith.constant 0 : i32
    %c0_i32_0 = arith.constant 0 : i32
    %c0_i32_1 = arith.constant 0 : i32
    return %c0_i32, %c0_i32_0 : i32, i32
  }
  func.func @transform_6(%arg0: i32) -> (i32, i32) {
    %c0_i32 = arith.constant 0 : i32
    %c0_i32_0 = arith.constant 0 : i32
    return %arg0, %c0_i32 : i32, i32
  }
}

</mosaic_0001>

<bundles_post_ra>
// kernel: dnnet_forward.1
= control target key start
LH: loop header
LB: loop body
LE: loop exit
PB: predicated region body
PF: predicated region fallthrough
CT: control target
= control target key end

     0   :  { %v1001_v44 = vmov 0.0   ;;  %vm1002_vm0 = vmmov 0   ;;  %vm438_vm1 = vcmask 130048   ;;  %s1265_s0 = inlined_call_operand.vmem [shape: f32[8,784], index: 0, kind: input, shape index: {}]   ;;  %s1266_s1 = inlined_call_operand.vmem [shape: bf16[784,128], index: 1, kind: input, shape index: {}]   ;;  %s1267_s2 = inlined_call_operand.vmem [shape: f32[1,128], index: 2, kind: input, shape index: {}]   ;;  %s1268_s3 = inlined_call_operand.vmem [shape: bf16[128,128], index: 3, kind: input, shape index: {}]   ;;  %s1269_s4 = inlined_call_operand.vmem [shape: f32[1,128], index: 4, kind: input, shape index: {}]   ;;  %s1270_s5 = inlined_call_operand.vmem [shape: f32[1,128], index: 5, kind: input, shape index: {}]   ;;  %s1271_s6 = inlined_call_operand.hbm [shape: f32[8,128], index: 6, kind: output, shape index: {}]  }
   0x1   :  { %v916_v0 = vld [vmem:[%s1266_s1 + $0x40] sm:$0xff]   ;;  %v920_v4 = vld [vmem:[%s1266_s1 + $0x48] sm:$0xff]   ;;  %v924_v8 = vld [vmem:[%s1266_s1 + $0x50] sm:$0xff]  }
   0x2   :  { %v917_v1 = vld [vmem:[%s1266_s1] sm:$0xff]   ;;  %810 = vmatprep.subr.bf16.mxu0 %v916_v0  ;;  %v921_v5 = vld [vmem:[%s1266_s1 + $0x8] sm:$0xff]   ;;  %v925_v9 = vld [vmem:[%s1266_s1 + $0x10] sm:$0xff]  }
   0x3   :  { %v918_v2 = vld [vmem:[%s1266_s1 + $0xc0] sm:$0xff]   ;;  %811 = vmatpush3.bf16.msra.mxu0 %v917_v1  ;;  %v922_v6 = vld [vmem:[%s1266_s1 + $0xc8] sm:$0xff]   ;;  %v926_v10 = vld [vmem:[%s1266_s1 + $0xd0] sm:$0xff]  }
   0x4   :  { %v919_v3 = vld [vmem:[%s1266_s1 + $0x80] sm:$0xff]   ;;  %832 = vmatprep.subr.bf16.mxu1 %v918_v2  ;;  %812 = vmatprep.subr.bf16.mxu0 %v920_v4  ;;  %v923_v7 = vld [vmem:[%s1266_s1 + $0x88] sm:$0xff]   ;;  %v927_v11 = vld [vmem:[%s1266_s1 + $0x90] sm:$0xff]  }
   0x5   :  { %833 = vmatpush3.bf16.msra.mxu1 %v919_v3  ;;  %v928_v12 = vld [vmem:[%s1266_s1 + $0x58] sm:$0xff]   ;;  %v932_v16 = vld [vmem:[%s1266_s1 + $0x60] sm:$0xff]   ;;  %v936_v20 = vld [vmem:[%s1266_s1 + $0x68] sm:$0xff]  }
   0x6   :  { %834 = vmatprep.subr.bf16.mxu1 %v922_v6  ;;  %v929_v13 = vld [vmem:[%s1266_s1 + $0x18] sm:$0xff]   ;;  %v933_v17 = vld [vmem:[%s1266_s1 + $0x20] sm:$0xff]   ;;  %v937_v21 = vld [vmem:[%s1266_s1 + $0x28] sm:$0xff]  }
   0x7   :  { %813 = vmatpush3.bf16.msra.mxu0 %v921_v5  ;;  %v930_v14 = vld [vmem:[%s1266_s1 + $0xd8] sm:$0xff]   ;;  %v934_v18 = vld [vmem:[%s1266_s1 + $0xe0] sm:$0xff]   ;;  %v938_v22 = vld [vmem:[%s1266_s1 + $0xe8] sm:$0xff]  }
   0x8   :  { %814 = vmatprep.subr.bf16.mxu0 %v924_v8  ;;  %v931_v15 = vld [vmem:[%s1266_s1 + $0x98] sm:$0xff]   ;;  %v935_v19 = vld [vmem:[%s1266_s1 + $0xa0] sm:$0xff]   ;;  %v939_v23 = vld [vmem:[%s1266_s1 + $0xa8] sm:$0xff]  }
   0x9   :  { %835 = vmatpush3.bf16.msra.mxu1 %v923_v7  ;;  %v940_v24 = vld [vmem:[%s1266_s1 + $0x70] sm:$0xff]   ;;  %v944_v28 = vld [vmem:[%s1266_s1 + $0x78] sm:$0xff]   ;;  %v26_v31 = vld [vmem:[%s1265_s0 + $0x8] sm:$0xff] }
   0xa   :  { %836 = vmatprep.subr.bf16.mxu1 %v926_v10  ;;  %v941_v25 = vld [vmem:[%s1266_s1 + $0x30] sm:$0xff]   ;;  %v945_v29 = vld [vmem:[%s1266_s1 + $0x38] sm:$0xff]   ;;  %v33_v32 = vpack.c.bf16 %v26_v31, %v26_v31  ;;  %v25_v34 = vld [vmem:[%s1265_s0] sm:$0xff] }
   0xb   :  { %815 = vmatpush3.bf16.msra.mxu0 %v925_v9  ;;  %v942_v26 = vld [vmem:[%s1266_s1 + $0xf0] sm:$0xff]   ;;  %v946_v30 = vld [vmem:[%s1266_s1 + $0xf8] sm:$0xff]   ;;  %v32_v35 = vpack.c.bf16 %v25_v34, %v25_v34  ;;  %v948_v36 = vld [vmem:[%s1266_s1 + $0x140] sm:$0xff]  }
   0xc   :  { %816 = vmatprep.subr.bf16.mxu0 %v928_v12  ;;  %v943_v27 = vld [vmem:[%s1266_s1 + $0xb0] sm:$0xff]   ;;  %v947_v33 = vld [vmem:[%s1266_s1 + $0xb8] sm:$0xff]   ;;  %474 = vmatprep.mubr.bf16.mxu0 %v33_v32  ;;  %v949_v39 = vld [vmem:[%s1266_s1 + $0x100] sm:$0xff]  }
   0xd   :  { %837 = vmatpush3.bf16.msra.mxu1 %v927_v11  ;;  %v28_v37 = vld [vmem:[%s1265_s0 + $0x18] sm:$0xff]  ;;  %v27_v40 = vld [vmem:[%s1265_s0 + $0x10] sm:$0xff]  ;;  %v950_v42 = vld [vmem:[%s1266_s1 + $0x148] sm:$0xff]  }
   0xe   :  { %838 = vmatprep.subr.bf16.mxu1 %v930_v14  ;;  %v35_v38 = vpack.c.bf16 %v28_v37, %v28_v37  ;;  %v34_v41 = vpack.c.bf16 %v27_v40, %v27_v40  ;;  %v951_v43 = vld [vmem:[%s1266_s1 + $0x108] sm:$0xff]   ;;  %v952_v45 = vld [vmem:[%s1266_s1 + $0x150] sm:$0xff]   ;;  %v954_v47 = vld [vmem:[%s1266_s1 + $0x158] sm:$0xff]  }
   0xf   :  { %817 = vmatpush3.bf16.msra.mxu0 %v929_v13  ;;  %v953_v46 = vld [vmem:[%s1266_s1 + $0x110] sm:$0xff]   ;;  %v955_v48 = vld [vmem:[%s1266_s1 + $0x118] sm:$0xff]   ;;  %v956_v49 = vld [vmem:[%s1266_s1 + $0x160] sm:$0xff]  }
  0x10   :  { %818 = vmatprep.subr.bf16.mxu0 %v932_v16  ;;  %514 = vmatprep.mubr.bf16.mxu1 %v35_v38  ;;  %v957_v50 = vld [vmem:[%s1266_s1 + $0x120] sm:$0xff]   ;;  %v958_v51 = vld [vmem:[%s1266_s1 + $0x168] sm:$0xff]   ;;  %v960_v55 = vld [vmem:[%s1266_s1 + $0x170] sm:$0xff]  }
  0x11   :  { %839 = vmatpush3.bf16.msra.mxu1 %v931_v15  ;;  %v959_v52 = vld [vmem:[%s1266_s1 + $0x128] sm:$0xff]   ;;  %v964_v53 = vld [vmem:[%s1266_s1 + $0x180] sm:$0xff]   ;;  %v31_v57 = vld [vmem:[%s1265_s0 + $0x30] sm:$0xff] }
  0x12   :  { %840 = vmatprep.subr.bf16.mxu1 %v934_v18  ;;  %v30_v54 = vld [vmem:[%s1265_s0 + $0x28] sm:$0xff]  ;;  %v38_v58 = vpack.c.bf16 %v31_v57, %v31_v57  ;;  %v961_v59 = vld [vmem:[%s1266_s1 + $0x130] sm:$0xff]  }
  0x13   :  { %819 = vmatpush3.bf16.msra.mxu0 %v933_v17  ;;  %v37_v56 = vpack.c.bf16 %v30_v54, %v30_v54 }
  0x14   :  { %820 = vmatprep.subr.bf16.mxu0 %v936_v20 }
  0x15   :  { %841 = vmatpush3.bf16.msra.mxu1 %v935_v19 }
  0x16   :  { %842 = vmatprep.subr.bf16.mxu1 %v938_v22 }
  0x17   :  { %821 = vmatpush3.bf16.msra.mxu0 %v937_v21 }
  0x18   :  { %822 = vmatprep.subr.bf16.mxu0 %v940_v24 }
  0x19   :  { %843 = vmatpush3.bf16.msra.mxu1 %v939_v23 }
  0x1a   :  { %844 = vmatprep.subr.bf16.mxu1 %v942_v26 }
  0x1b   :  { %823 = vmatpush3.bf16.msra.mxu0 %v941_v25 }
  0x1c   :  { %824 = vmatprep.subr.bf16.mxu0 %v944_v28 }
  0x1d   :  { %845 = vmatpush3.bf16.msra.mxu1 %v943_v27 }
  0x1e   :  { %846 = vmatprep.subr.bf16.mxu1 %v946_v30 }
  0x1f   :  { %825 = vmatpush3.bf16.msra.mxu0 %v945_v29 }
  0x20   :  { %854 = vmatprep.subr.bf16.mxu0 %v948_v36 }
  0x21   :  { %847 = vmatpush3.bf16.msra.mxu1 %v947_v33 }
  0x22   :  { %475 = vmatmul.mubr.bf16.vlgmr.msra.gmra.mrb[0].mxu0 %v32_v35  ;;  %887 = vmatprep.subr.bf16.mxu1 %v1001_v44 }
  0x23   :  { %855 = vmatpush3.bf16.msra.mxu0 %v949_v39  ;;  %554 = vmatprep.mubr.bf16.mxu0 %v37_v56 }
  0x24   :  { %515 = vmatmul.mubr.bf16.vlgmr.msra.gmra.mrb[0].mxu1 %v34_v41  ;;  %856 = vmatprep.subr.bf16.mxu0 %v950_v42 }
  0x25   :  { %889 = vmatprep.mubr.msk.bf16.mxu1 %vm1002_vm0, %v1001_v44  ;;  %888 = vmatpush3.bf16.msra.mxu1 %v964_v53 }
  0x26   :  { %893 = vmatprep.subr.bf16.mxu1 %v1001_v44 }
  0x27   :  { %857 = vmatpush3.bf16.msra.mxu0 %v951_v43 }
  0x28   :  { %858 = vmatprep.subr.bf16.mxu0 %v952_v45 }
  0x2b   :  { %859 = vmatpush3.bf16.msra.mxu0 %v953_v46 }
  0x2c   :  { %860 = vmatprep.subr.bf16.mxu0 %v954_v47  ;;  %890 = vmatmul.mubr.msk.bf16.vlgmr.msra.gmra.mrb[4].mxu1 %vm438_vm1, %v38_v58 }
  0x2d   :  { %909 = vmatprep.mubr.msk.bf16.mxu1 %vm1002_vm0, %v1001_v44 }
  0x2f   :  { %861 = vmatpush3.bf16.msra.mxu0 %v955_v48 }
  0x30   :  { %862 = vmatprep.subr.bf16.mxu0 %v956_v49 }
  0x33   :  { %863 = vmatpush3.bf16.msra.mxu0 %v957_v50 }
  0x34   :  { %864 = vmatprep.subr.bf16.mxu0 %v958_v51 }
  0x37   :  { %865 = vmatpush3.bf16.msra.mxu0 %v959_v52 }
  0x38   :  { %11 = vsyncpa [#allocation3], 0  ;;  %866 = vmatprep.subr.bf16.mxu0 %v960_v55  ;;  %v962_v60 = vld [vmem:[%s1266_s1 + $0x178] sm:$0xff]   ;;  %v29_v62 = vld [vmem:[%s1265_s0 + $0x20] sm:$0xff] }
  0x39   :  { %v963_v61 = vld [vmem:[%s1266_s1 + $0x138] sm:$0xff]   ;;  %v36_v63 = vpack.c.bf16 %v29_v62, %v29_v62  ;;  %v965_v0 = vld [vmem:[%s1268_s3] sm:$0xff]   ;;  %v966_v1 = vld [vmem:[%s1268_s3 + $0x8] sm:$0xff]  }
  0x3a   :  { %894 = vmatpush3.bf16.msra.mxu1 %v965_v0  ;;  %v967_v2 = vld [vmem:[%s1268_s3 + $0x10] sm:$0xff]   ;;  %v968_v3 = vld [vmem:[%s1268_s3 + $0x18] sm:$0xff]   ;;  %v969_v4 = vld [vmem:[%s1268_s3 + $0x20] sm:$0xff]  }
  0x3b   :  { %867 = vmatpush3.bf16.msra.mxu0 %v961_v59  ;;  %895 = vmatprep.subr.bf16.mxu1 %v1001_v44  ;;  %v970_v5 = vld [vmem:[%s1268_s3 + $0x28] sm:$0xff]   ;;  %v971_v6 = vld [vmem:[%s1268_s3 + $0x30] sm:$0xff]   ;;  %v972_v7 = vld [vmem:[%s1268_s3 + $0x38] sm:$0xff]  }
  0x3c   :  { %868 = vmatprep.subr.bf16.mxu0 %v962_v60  ;;  %v749_v9 = vld [vmem:[%s1267_s2] ss:$0 sm:$0xff] }
  0x3d   :  { %v800_v34 = vld [vmem:[%s1269_s4] ss:$0 sm:$0xff]  ;;  %s1003_s4 = smov [#allocation2]  }
  0x3e   :  { %896 = vmatpush3.bf16.msra.mxu1 %v966_v1  ;;  %v809_v39 = vld [vmem:[%s1270_s5] ss:$0 sm:$0xff]  ;;  %s741_s7 = sshll.u32 %s1003_s4, 4  ;;  %s742_s7 = int_to_ptr.vmem [resolvable:$true] %s741_s7 }
  0x3f   :  { %869 = vmatpush3.bf16.msra.mxu0 %v963_v61  ;;  %897 = vmatprep.subr.bf16.mxu1 %v1001_v44  ;;  %s977_s5 = scalar_lea.vmem %s742_s7, 128  ;;  %p982_p1 = scmp.lt.s32.totalorder %s742_s7, %s742_s7 }
  0x40   :  { %p978_p0 = scmp.ne.s32.totalorder %s742_s7, %s977_s5  ;;  %p983_p2 = scmp.lt.s32.totalorder %s977_s5, %s977_s5 }
  0x42   :  { %555 = vmatmul.mubr.bf16.vlgmr.msra.gmra.mrb[4].mxu0 %v36_v63  ;;  %898 = vmatpush3.bf16.msra.mxu1 %v967_v2  ;;  %p984_p3 = por %p983_p2, %p982_p1 }
  0x43   :  { %899 = vmatprep.subr.bf16.mxu1 %v1001_v44 }
  0x44   :  { %p985_p4 = pnand %p984_p3, %p978_p0 }
  0x46   :  { %900 = vmatpush3.bf16.msra.mxu1 %v968_v3 }
  0x47   :  { %901 = vmatprep.subr.bf16.mxu1 %v1001_v44 }
  0x4a   :  { %902 = vmatpush3.bf16.msra.mxu1 %v969_v4 }
  0x4b   :  { %903 = vmatprep.subr.bf16.mxu1 %v1001_v44 }
  0x4e   :  { %904 = vmatpush3.bf16.msra.mxu1 %v970_v5 }
  0x4f   :  { %905 = vmatprep.subr.bf16.mxu1 %v1001_v44 }
  0x52   :  { %906 = vmatpush3.bf16.msra.mxu1 %v971_v6 }
  0x53   :  { %907 = vmatprep.subr.bf16.mxu1 %v1001_v44 }
  0x56   :  { %908 = vmatpush3.bf16.msra.mxu1 %v972_v7 }
  0xf5   :  { %v826_v8 = vpop.f32.mrb[0].mxu0 }
  0xf6   :  { %v827_v10 = vpop.f32.mrb[1].mxu0 }
  0xf7   :  { %v828_v11 = vadd.f32 %v827_v10, %v826_v8  ;;  %v829_v12 = vpop.f32.mrb[2].mxu0  ;;  %v848_v13 = vpop.f32.mrb[0].mxu1 }
  0xf8   :  { %v830_v14 = vpop.f32.mrb[3].mxu0  ;;  %v849_v16 = vpop.f32.mrb[1].mxu1 }
  0xf9   :  { %v477_v15 = vadd.f32 %v828_v11, %v749_v9  ;;  %v850_v17 = vadd.f32 %v849_v16, %v848_v13  ;;  %v851_v18 = vpop.f32.mrb[2].mxu1 }
  0xfa   :  { %v852_v19 = vpop.f32.mrb[3].mxu1 }
  0xfb   :  { %v517_v20 = vadd.f32 %v850_v17, %v477_v15 }
  0xff   :  { %v596_v21 = vpop.f32.mrb[4].mxu1 }
 0x100   :  { %v891_v22 = vpop.f32.mrb[5].mxu1 }
 0x101   :  { %v599_v23 = vpop.f32.mrb[6].mxu1 }
 0x102   :  { %v892_v24 = vpop.f32.mrb[7].mxu1 }
 0x115   :  { %v870_v25 = vpop.f32.mrb[4].mxu0 }
 0x116   :  { %v871_v26 = vpop.f32.mrb[5].mxu0 }
 0x117   :  { %v872_v27 = vadd.f32 %v871_v26, %v870_v25  ;;  %v873_v28 = vpop.f32.mrb[6].mxu0 }
 0x118   :  { %v874_v29 = vpop.f32.mrb[7].mxu0 }
 0x119   :  { %v557_v30 = vadd.f32 %v872_v27, %v517_v20 }
 0x11b   :  { %v597_v31 = vadd.f32 %v596_v21, %v557_v30 }
 0x11d   :  { %v602_v32 = vmax.f32 %v597_v31, 0.0 }
 0x11f   :  { %v603_v33 = vpack.c.bf16 %v602_v32, %v602_v32 }
 0x121   :  { %910 = vmatmul.mubr.bf16.vlgmr.msra.gmra.mrb[8].mxu1 %v603_v33 }
 0x1f4   :  { %v709_v35 = vpop.f32.mrb[8].mxu1 }
 0x1f5   :  { %v710_v36 = vadd.f32 %v800_v34, %v709_v35  ;;  %v911_v37 = vpop.f32.mrb[9].mxu1 }
 0x1f6   :  { %v712_v38 = vpop.f32.mrb[10].mxu1 }
 0x1f7   :  { %v715_v40 = vmax.f32 %v710_v36, 0.0  ;;  %v912_v41 = vpop.f32.mrb[11].mxu1 }
 0x1f9   :  { %v723_v42 = vadd.f32 %v809_v39, %v715_v40 }
 0x1fb   :  { %724 = vmax.xlane.f32.xlu0 %v723_v42 }
 0x288   :  { %v725_v43 = vpop.xlane.xlu0 %724 }
 0x289   :  { %v726_v44 = vsub.f32 %v723_v42, %v725_v43 }
 0x28b   :  { %v727_v45 = vmul.f32 1.442695, %v726_v44 }
 0x28d   :  { %973 = vpow2.f32 %v727_v45 }
 0x297   :  { %v974_v46 = vpop.eup %973 }
 0x298   :  { %729 = vadd.xlane.f32.xlu0 %v974_v46 }
 0x325   :  { %v730_v47 = vpop.xlane.xlu0 %729 }
 0x326   :  { %975 = vlog2.f32 %v730_v47 }
 0x330   :  { %v976_v48 = vpop.eup %975 }
 0x331   :  { %v732_v49 = vmul.f32 0.6931472, %v976_v48 }
 0x333   :  { %v733_v50 = vsub.f32 %v726_v44, %v732_v49 }
 0x335   :  { %734 = vst [vmem:[#allocation2] sm:$0xff] %v733_v50 }
 0x336   :  { %988 = shalt.err (!%p985_p4)
}
 0x337   :  { %s989_s10 = scalar_lea.hbm %s1271_s6, 128 }
 0x338   :  { %p990_p5 = scmp.ne.s32.totalorder %s1271_s6, %s989_s10  ;;  %p993_p6 = scmp.lt.u32.totalorder %s989_s10, %s1271_s6 }
 0x33a   :  { %p995_p7 = pnand %p993_p6, %p990_p5 }
 0x33c   :  { %998 = shalt.err (!%p995_p7)
}
 0x33d   :  { %744 = dma.vmem_to_hbm [thread:$0]  %s742_s7, 128, %s1271_s6, [#allocation3]  }
 0x33e   :  { %999 = dma.done.wait [#allocation3], 128  }
 0x33f   :  { %1000 = vsyncadd [#allocation3], 4294967168 }
 0x340   :  { %748 = vsyncpa [#allocation3], 1 }

</bundles_post_ra>
